<compile_context>
chip_gen: v6e
topology: v6e:2x2x1
jax: 0.10.0
libtpu: 0.0.40
codegen_flags: <defaults>
</compile_context>

<pallas_src>
import functools

import jax
import jax.numpy as jnp
from jax import lax
from jax.experimental import pallas as pl
from jax.experimental.pallas import tpu as pltpu

LANE = 128       # vreg lane width (last dim)
SUBLANE = 8      # vreg sublane width (second-to-last dim)
MAX_TILE = 256   # 256-aligned tiles match the 2x256x256 MXU on v6e/v7x


def _round_up(n, m):
    return pl.cdiv(n, m) * m


# ---------------------------------------------------------------------------
# Phase 1: y = tanh(x @ W1 + b1) @ W2 + b2, tiled over batch rows.
# ---------------------------------------------------------------------------
def _y_kernel(x_ref, w1_ref, b1_ref, w2_ref, b2_ref, y_ref, *,
              batch, row_tile, mxu_dtype):
    x = x_ref[...].astype(mxu_dtype)
    w1 = w1_ref[...].astype(mxu_dtype)
    h = jnp.dot(x, w1, preferred_element_type=jnp.float32) + b1_ref[...]
    h = jnp.tanh(h)  # keep f32: required on v5e (no bf16 VPU/EUP), free on v6e/v7x
    w2 = w2_ref[...].astype(mxu_dtype)
    y = jnp.dot(h.astype(mxu_dtype), w2,
                preferred_element_type=jnp.float32) + b2_ref[...]
    # Zero padded rows (row >= batch) so the Gram's padded rows/columns are exactly
    # zero (padded zero x rows alone would give y = tanh(b1) @ W2 + b2, i.e. junk).
    rows = pl.program_id(0) * row_tile + lax.broadcasted_iota(jnp.int32, y.shape, 0)
    y = jnp.where(rows < batch, y, 0.0)
    y_ref[...] = y.astype(y_ref.dtype)


# ---------------------------------------------------------------------------
# Phase 2: Gram matrix  out = y @ y.T, tiled over (i, j) output tiles.
# ---------------------------------------------------------------------------
def _gram_kernel(yl_ref, yr_ref, o_ref):
    # F.linear(y, y) == y @ y.T: contract the shared last axis directly
    # (MXU-native NT matmul, no transpose/relayout), accumulate in f32.
    o_ref[...] = lax.dot_general(
        yl_ref[...], yr_ref[...],
        dimension_numbers=(((1,), (1,)), ((), ())),
        preferred_element_type=jnp.float32,
    ).astype(o_ref.dtype)


def netgirl_forward(x, w1_t, b1, w2_t, b2, *, mxu_dtype=jnp.bfloat16):
    """x: (B, input_dim); w1_t: (input_dim, hidden); w2_t: (hidden, output_dim).

    Returns (B, B) = y @ y.T with y = layer2(tanh(layer1(x))).
    mxu_dtype: dtype of MXU operands (bf16 fast path, f32 for bit-tight checks).
    """
    B, in_dim = x.shape
    hidden = w1_t.shape[1]
    out_dim = w2_t.shape[1]

    # Row padding: only up to the row-tile size (multiple of 8), NOT to 128 lanes —
    # the forward pass runs on (almost) exactly B rows.
    b_sub = _round_up(B, SUBLANE)
    row_tile = min(MAX_TILE, b_sub)
    b_pad = _round_up(B, row_tile)

    if b_pad != B:
        x_in = jnp.zeros((b_pad, in_dim), x.dtype).at[:B, :].set(x)
    else:
        x_in = x

    # ---- Phase 1: compute y (stored in mxu_dtype; bf16 halves HBM/VMEM bytes). ----
    y = pl.pallas_call(
        functools.partial(_y_kernel, batch=B, row_tile=row_tile,
                          mxu_dtype=mxu_dtype),
        out_shape=jax.ShapeDtypeStruct((b_pad, out_dim), mxu_dtype),
        grid=(b_pad // row_tile,),
        in_specs=[
            pl.BlockSpec((row_tile, in_dim), lambda i: (i, 0)),
            # Weights / biases: index_map always returns block (0, 0) -> they stay
            # resident in VMEM across all grid steps (no per-step re-DMA).
            pl.BlockSpec((in_dim, hidden), lambda i: (0, 0)),
            pl.BlockSpec((1, hidden), lambda i: (0, 0)),
            pl.BlockSpec((hidden, out_dim), lambda i: (0, 0)),
            pl.BlockSpec((1, out_dim), lambda i: (0, 0)),
        ],
        out_specs=pl.BlockSpec((row_tile, out_dim), lambda i: (i, 0)),
        compiler_params=pltpu.CompilerParams(
            dimension_semantics=("parallel",)),
    )(x_in, w1_t, b1, w2_t, b2)

    # ---- Phase 2: tiled symmetric-shaped Gram y @ y.T. ----
    tm = tn = min(MAX_TILE, b_pad)
    out_pad = pl.pallas_call(
        _gram_kernel,
        out_shape=jax.ShapeDtypeStruct((b_pad, b_pad), jnp.float32),
        grid=(b_pad // tm, b_pad // tn),
        in_specs=[
            pl.BlockSpec((tm, out_dim), lambda i, j: (i, 0)),
            pl.BlockSpec((tn, out_dim), lambda i, j: (j, 0)),
        ],
        out_specs=pl.BlockSpec((tm, tn), lambda i, j: (i, j)),
        compiler_params=pltpu.CompilerParams(
            # Both output-tile axes are independent -> megacore sharding on v7x.
            dimension_semantics=("parallel", "parallel"),
            # Headroom-safe on v7x (64 MiB physical); lifts v5e's 16 MiB default.
            vmem_limit_bytes=48 * 1024 * 1024),
    )(y, y)

    if b_pad != B:
        out_pad = out_pad[:B, :B]
    return out_pad


def init_params(key, input_dim, num_hidden, output_dim):
    # Deterministic init mimicking nn.Linear's U(-1/sqrt(fan_in), 1/sqrt(fan_in)).
    k1, k2, k3, k4 = jax.random.split(key, 4)
    lim1 = 1.0 / (input_dim ** 0.5)
    lim2 = 1.0 / (num_hidden ** 0.5)
    # Weights stored already transposed: (in_features, out_features).
    w1_t = jax.random.uniform(k1, (input_dim, num_hidden), jnp.float32, -lim1, lim1)
    b1 = jax.random.uniform(k2, (1, num_hidden), jnp.float32, -lim1, lim1)
    w2_t = jax.random.uniform(k3, (num_hidden, output_dim), jnp.float32, -lim2, lim2)
    b2 = jax.random.uniform(k4, (1, output_dim), jnp.float32, -lim2, lim2)
    return w1_t, b1, w2_t, b2


def reference_forward(x, w1_t, b1, w2_t, b2):
    h = jnp.tanh(x @ w1_t + b1)
    y = h @ w2_t + b2
    return y @ y.T


if __name__ == "__main__":
    batch = 8
    input_dim = 16
    num_hidden = 32
    output_dim = 16

    key = jax.random.PRNGKey(0)
    kx, kp = jax.random.split(key)
    x = jax.random.normal(kx, (batch, input_dim), jnp.float32)
    w1_t, b1, w2_t, b2 = init_params(kp, input_dim, num_hidden, output_dim)

    ref = reference_forward(x, w1_t, b1, w2_t, b2)

    # Fast path: bf16 MXU operands, f32 accumulation (loose tolerance vs f32 ref).
    out_bf16 = jax.block_until_ready(netgirl_forward(x, w1_t, b1, w2_t, b2))
    # Exact-check path: f32 MXU operands.
    out_f32 = jax.block_until_ready(
        netgirl_forward(x, w1_t, b1, w2_t, b2, mxu_dtype=jnp.float32))

    assert out_bf16.shape == (batch, batch), out_bf16.shape
    assert out_f32.shape == (batch, batch), out_f32.shape
    assert jnp.allclose(out_f32, ref, atol=1e-4, rtol=1e-4), "f32 path mismatch"
    assert jnp.allclose(out_bf16, ref, atol=1e-1, rtol=1e-1), "bf16 path mismatch"
    print("KERNEL_OK")
</pallas_src>

<mosaic_0001>
module attributes {stable_mosaic.version = 11 : i64} {
  func.func @_y_kernel(%arg0: i32, %arg1: memref<8x16xf32, #tpu.memory_space<vmem>>, %arg2: memref<16x32xf32, #tpu.memory_space<vmem>>, %arg3: memref<1x32xf32, #tpu.memory_space<vmem>>, %arg4: memref<32x16xf32, #tpu.memory_space<vmem>>, %arg5: memref<1x16xf32, #tpu.memory_space<vmem>>, %arg6: memref<8x16xbf16, #tpu.memory_space<vmem>>) attributes {dimension_semantics = [#tpu.dimension_semantics<parallel>], iteration_bounds = array<i64: 1>, scalar_prefetch = 0 : i64, scratch_operands = 0 : i64, tpu.core_type = #tpu.core_type<tc>, window_params = [{transform_indices = @transform_0, window_bounds = array<i64: 8, 16>}, {pipeline_mode = #tpu.pipeline_mode<synchronous>, transform_indices = @transform_1, window_bounds = array<i64: 16, 32>}, {pipeline_mode = #tpu.pipeline_mode<synchronous>, transform_indices = @transform_2, window_bounds = array<i64: 1, 32>}, {pipeline_mode = #tpu.pipeline_mode<synchronous>, transform_indices = @transform_3, window_bounds = array<i64: 32, 16>}, {pipeline_mode = #tpu.pipeline_mode<synchronous>, transform_indices = @transform_4, window_bounds = array<i64: 1, 16>}, {transform_indices = @transform_5, window_bounds = array<i64: 8, 16>}]} {
    %c0 = arith.constant 0 : index
    %c0_0 = arith.constant 0 : index
    %0 = vector.load %arg1[%c0, %c0_0] : memref<8x16xf32, #tpu.memory_space<vmem>>, vector<8x16xf32>
    %1 = arith.truncf %0 : vector<8x16xf32> to vector<8x16xbf16>
    %c0_1 = arith.constant 0 : index
    %c0_2 = arith.constant 0 : index
    %2 = vector.load %arg2[%c0_1, %c0_2] : memref<16x32xf32, #tpu.memory_space<vmem>>, vector<16x32xf32>
    %3 = arith.truncf %2 : vector<16x32xf32> to vector<16x32xbf16>
    %cst = arith.constant dense<0.000000e+00> : vector<8x32xf32>
    %4 = tpu.matmul %1, %3, %cst {dimension_numbers = #tpu.dot_dimension_numbers<[1], [0], [0], [1], [0, 0, 1, 1], [], []>} : vector<8x16xbf16>, vector<16x32xbf16>, vector<8x32xf32> -> vector<8x32xf32>
    %c0_3 = arith.constant 0 : index
    %c0_4 = arith.constant 0 : index
    %5 = vector.load %arg3[%c0_3, %c0_4] : memref<1x32xf32, #tpu.memory_space<vmem>>, vector<1x32xf32>
    %6 = vector.broadcast %5 : vector<1x32xf32> to vector<8x32xf32>
    %7 = arith.addf %4, %6 : vector<8x32xf32>
    %8 = math.tanh %7 : vector<8x32xf32>
    %c0_5 = arith.constant 0 : index
    %c0_6 = arith.constant 0 : index
    %9 = vector.load %arg4[%c0_5, %c0_6] : memref<32x16xf32, #tpu.memory_space<vmem>>, vector<32x16xf32>
    %10 = arith.truncf %9 : vector<32x16xf32> to vector<32x16xbf16>
    %11 = arith.truncf %8 : vector<8x32xf32> to vector<8x32xbf16>
    %cst_7 = arith.constant dense<0.000000e+00> : vector<8x16xf32>
    %12 = tpu.matmul %11, %10, %cst_7 {dimension_numbers = #tpu.dot_dimension_numbers<[1], [0], [0], [1], [0, 0, 1, 1], [], []>} : vector<8x32xbf16>, vector<32x16xbf16>, vector<8x16xf32> -> vector<8x16xf32>
    %c0_8 = arith.constant 0 : index
    %c0_9 = arith.constant 0 : index
    %13 = vector.load %arg5[%c0_8, %c0_9] : memref<1x16xf32, #tpu.memory_space<vmem>>, vector<1x16xf32>
    %14 = vector.broadcast %13 : vector<1x16xf32> to vector<8x16xf32>
    %15 = arith.addf %12, %14 : vector<8x16xf32>
    %c8_i32 = arith.constant 8 : i32
    %16 = arith.muli %arg0, %c8_i32 : i32
    %17 = tpu.iota {dimensions = array<i32: 0>} : vector<8x16xi32>
    %18 = vector.broadcast %16 : i32 to vector<8x16xi32>
    %19 = arith.addi %18, %17 : vector<8x16xi32>
    %c8_i32_10 = arith.constant 8 : i32
    %20 = vector.broadcast %c8_i32_10 : i32 to vector<8x16xi32>
    %21 = arith.cmpi slt, %19, %20 : vector<8x16xi32>
    %cst_11 = arith.constant 0.000000e+00 : f32
    %22 = vector.broadcast %cst_11 : f32 to vector<8x16xf32>
    %23 = arith.select %21, %15, %22 : vector<8x16xi1>, vector<8x16xf32>
    %24 = arith.truncf %23 : vector<8x16xf32> to vector<8x16xbf16>
    %c0_12 = arith.constant 0 : index
    %c0_13 = arith.constant 0 : index
    %25 = vector.load %arg6[%c0_12, %c0_13] : memref<8x16xbf16, #tpu.memory_space<vmem>>, vector<8x16xbf16>
    tpu.vector_store %arg6[%c0_12, %c0_13], %24 {strides = array<i32>} : memref<8x16xbf16, #tpu.memory_space<vmem>>, vector<8x16xbf16>,
    return
  }
  func.func @transform_0(%arg0: i32) -> (i32, i32) {
    %c0_i32 = arith.constant 0 : i32
    %c0_i32_0 = arith.constant 0 : i32
    return %arg0, %c0_i32 : i32, i32
  }
  func.func @transform_1(%arg0: i32) -> (i32, i32) {
    %c0_i32 = arith.constant 0 : i32
    %c0_i32_0 = arith.constant 0 : i32
    %c0_i32_1 = arith.constant 0 : i32
    return %c0_i32, %c0_i32_0 : i32, i32
  }
  func.func @transform_2(%arg0: i32) -> (i32, i32) {
    %c0_i32 = arith.constant 0 : i32
    %c0_i32_0 = arith.constant 0 : i32
    %c0_i32_1 = arith.constant 0 : i32
    return %c0_i32, %c0_i32_0 : i32, i32
  }
  func.func @transform_3(%arg0: i32) -> (i32, i32) {
    %c0_i32 = arith.constant 0 : i32
    %c0_i32_0 = arith.constant 0 : i32
    %c0_i32_1 = arith.constant 0 : i32
    return %c0_i32, %c0_i32_0 : i32, i32
  }
  func.func @transform_4(%arg0: i32) -> (i32, i32) {
    %c0_i32 = arith.constant 0 : i32
    %c0_i32_0 = arith.constant 0 : i32
    %c0_i32_1 = arith.constant 0 : i32
    return %c0_i32, %c0_i32_0 : i32, i32
  }
  func.func @transform_5(%arg0: i32) -> (i32, i32) {
    %c0_i32 = arith.constant 0 : i32
    %c0_i32_0 = arith.constant 0 : i32
    return %arg0, %c0_i32 : i32, i32
  }
}

</mosaic_0001>

<bundles_post_ra>
// kernel: tpu_custom_call.1
= control target key start
LH: loop header
LB: loop body
LE: loop exit
PB: predicated region body
PF: predicated region fallthrough
CT: control target
= control target key end

     0   :  { %v211_v3 = vmov 0.0   ;;  %vm212_vm0 = vmmov 0   ;;  %s274_s0 = inlined_call_operand.vmem [shape: f32[8,16], index: 0, kind: input, shape index: {}]   ;;  %s275_s1 = inlined_call_operand.vmem [shape: f32[16,32], index: 1, kind: input, shape index: {}]   ;;  %s276_s2 = inlined_call_operand.vmem [shape: f32[1,32], index: 2, kind: input, shape index: {}]   ;;  %s277_s3 = inlined_call_operand.vmem [shape: f32[32,16], index: 3, kind: input, shape index: {}]   ;;  %s278_s4 = inlined_call_operand.vmem [shape: f32[1,16], index: 4, kind: input, shape index: {}]   ;;  %s279_s5 = inlined_call_operand.hbm [shape: bf16[8,16], index: 5, kind: output, shape index: {}]  }
   0x1   :  { %v24_v0 = vld [vmem:[%s275_s1] sm:$0xff]  ;;  %v25_v1 = vld [vmem:[%s275_s1 + $0x8] sm:$0xff]  ;;  %170 = vmatprep.subr.bf16.mxu0 %v211_v3  ;;  %172 = vmatprep.mubr.msk.bf16.mxu0 %vm212_vm0, %v211_v3 }
   0x2   :  { %v22_v2 = vld [vmem:[%s274_s0] sm:$0xff]  ;;  %v26_v4 = vpack.c.bf16 %v25_v1, %v24_v0 }
   0x3   :  { %10 = vsyncpa [#allocation3], 0  ;;  %v23_v5 = vpack.c.bf16 %v22_v2, %v22_v2  ;;  %176 = vmatprep.subr.bf16.mxu1 %v211_v3  ;;  %180 = vmatprep.mubr.msk.bf16.mxu1 %vm212_vm0, %v211_v3  ;;  %vm34_vm1 = vcmask 130048   ;;  %v81_v6 = vld [vmem:[%s277_s3 + $0x10] sm:$0xff]  ;;  %v82_v7 = vld [vmem:[%s277_s3 + $0x18] sm:$0xff]  ;;  %vm93_vm2 = vcmask 261120  }
   0x4   :  { %171 = vmatpush3.bf16.msra.mxu0 %v26_v4  ;;  %v84_v8 = vpack.c.bf16 %v82_v7, %v81_v6  ;;  %v79_v9 = vld [vmem:[%s277_s3] sm:$0xff]  ;;  %v80_v10 = vld [vmem:[%s277_s3 + $0x8] sm:$0xff]  ;;  %s213_s3 = smov [#allocation2]   ;;  %vm145_vm3 = vcmask 125952  }
   0x5   :  { %v83_v11 = vpack.c.bf16 %v80_v10, %v79_v9  ;;  %v161_v12 = vld [vmem:[%s276_s2] ss:$0 sm:$0xff]  ;;  %s153_s9 = sshll.u32 %s213_s3, 4  ;;  %s154_s9 = int_to_ptr.vmem [resolvable:$true] %s153_s9 }
   0x6   :  { %177 = vmatpush3.bf16.msra.mxu1 %v84_v8  ;;  %v163_v20 = vld [vmem:[%s278_s4] ss:$0 sm:$0xff]  ;;  %s189_s2 = scalar_lea.vmem %s154_s9, 64  ;;  %p194_p1 = scmp.lt.s32.totalorder %s154_s9, %s154_s9 }
   0x7   :  { %173 = vmatmul.mubr.msk.bf16.vlgmr.msra.gmra.mxu0 %vm34_vm1, %v23_v5  ;;  %178 = vmatprep.subr.bf16.mxu1 %v211_v3  ;;  %p190_p0 = scmp.ne.s32.totalorder %s154_s9, %s189_s2  ;;  %p195_p2 = scmp.lt.s32.totalorder %s189_s2, %s189_s2 }
   0x9   :  { %p196_p3 = por %p195_p2, %p194_p1 }
   0xa   :  { %179 = vmatpush3.bf16.msra.mxu1 %v83_v11 }
   0xb   :  { %p197_p4 = pnand %p196_p3, %p190_p0 }
  0xc7   :  { %v72_v13 = vpop.f32.mrf.mxu0 }
  0xc8   :  { %v73_v14 = vadd.f32 %v161_v12, %v72_v13 }
  0xc9   :  { %v174_v15 = vpop.f32.mrf.mxu0 }
  0xca   :  { %187 = vtanh.f32 %v73_v14 }
  0xcb   :  { %v75_v16 = vpop.f32.mrf.mxu0 }
  0xcd   :  { %v175_v17 = vpop.f32.mrf.mxu0 }
  0xd7   :  { %v188_v18 = vpop.eup %187 }
  0xd8   :  { %v85_v19 = vpack.c.bf16 %v188_v18, %v188_v18 }
  0xda   :  { %181 = vmatmul.mubr.msk.bf16.vlgmr.msra.gmra.mxu1 %vm93_vm2, %v85_v19 }
 0x19a   :  { %v131_v21 = vpop.f32.mrf.mxu1 }
 0x19b   :  { %v132_v22 = vadd.f32 %v163_v20, %v131_v21 }
 0x19c   :  { %v182_v23 = vpop.f32.mrf.mxu1 }
 0x19d   :  { %v144_v24 = vpack.c.bf16 %v132_v22, %v132_v22 }
 0x19e   :  { %v134_v25 = vpop.f32.mrf.mxu1 }
 0x19f   :  { %146 = vst.msk [vmem:[#allocation2] sm:$0xf] %vm145_vm3, %v144_v24 }
 0x1a0   :  { %v183_v26 = vpop.f32.mrf.mxu1 }
 0x1a1   :  { %200 = shalt.err (!%p197_p4)
}
 0x1a2   :  { %156 = dma.vmem_to_hbm [thread:$0]  %s154_s9, 64, %s279_s5, [#allocation3]  }
 0x1a3   :  { %209 = dma.done.wait [#allocation3], 64  }
 0x1a4   :  { %210 = vsyncadd [#allocation3], 4294967232 }
 0x1a5   :  { %160 = vsyncpa [#allocation3], 1 }

</bundles_post_ra>
